<compile_context>
chip_gen: v7x
topology: tpu7x:2x2x1
jax: 0.10.0
libtpu: 0.0.40
codegen_flags: <defaults>
</compile_context>

<pallas_src>
import jax
import jax.numpy as jnp
from jax.experimental import pallas as pl
from jax.experimental.pallas import tpu as pltpu


def _round_up(x, m):
    return ((x + m - 1) // m) * m


def _pick_tile(n, candidates):
    """Largest candidate that evenly divides n; fall back to the full dim."""
    for t in candidates:
        if t <= n and n % t == 0:
            return t
    return n


def _edge_add_kernel(a_ref, c_ref, o_ref):
    # a_ref: (TI, 1)  f32 row-node projections (bias already folded in)
    # c_ref: (1, TJ)  f32 col-node projections
    # o_ref: (TI, TJ) output tile
    o_ref[...] = (a_ref[...] + c_ref[...]).astype(o_ref.dtype)


def edge_decoder(z, weight, bias):
    """z: (B, N, H); weight: (1, 2H) torch-style Linear weight; bias: (1,).

    Returns edge_logits of shape (B, N, N) in z.dtype."""
    B, N, H = z.shape
    out_dtype = z.dtype
    itemsize = jnp.dtype(out_dtype).itemsize

    # --- Precompute per-node projections once (f32 accumulate, weights kept
    # f32 so bf16 z still sees full-precision weights); bias folded into `a`.
    w = weight.astype(jnp.float32)
    w_src, w_dst = w[0, :H], w[0, H:]
    a = jnp.einsum("bnh,h->bn", z, w_src,
                   preferred_element_type=jnp.float32) + bias.astype(jnp.float32)[0]
    c = jnp.einsum("bnh,h->bn", z, w_dst, preferred_element_type=jnp.float32)

    # --- Pad: i axis to a multiple of 8 (sublane), j axis to a multiple of 128
    # (lane-dense, unmasked stores); slice the padded output afterwards.
    n_i = _round_up(N, 8)
    n_j = _round_up(N, 128)
    a_p = jnp.pad(a, ((0, 0), (0, n_i - N)))[:, :, None]          # (B, n_i, 1)
    c_p = jnp.pad(c, ((0, 0), (0, n_j - N)))[:, None, :]          # (B, 1, n_j)

    # --- Output tiling: TJ a large multiple of 128, TI chosen so a tile stays
    # <= ~4 MiB (8 MiB double-buffered -> fits every generation's scoped VMEM).
    TJ = _pick_tile(n_j, (2048, 1024, 512, 256, 128))
    max_tile_bytes = 4 * 1024 * 1024
    ti_cands = tuple(t for t in (512, 256, 128, 64, 32, 16, 8)
                     if t * TJ * itemsize <= max_tile_bytes)
    TI = _pick_tile(n_i, ti_cands if ti_cands else (8,))
    NI = n_i // TI
    NJ = n_j // TJ

    # Double-buffered output tile + (lane/sublane-padded) input stripes + slack.
    vmem_bytes = int(2 * TI * TJ * itemsize            # output tile x2
                     + 2 * TI * 128 * 4                # (TI,1) stripe, lane-padded
                     + 2 * 8 * TJ * 4                  # (1,TJ) stripe, sublane-padded
                     + (4 << 20))

    out = pl.pallas_call(
        _edge_add_kernel,
        out_shape=jax.ShapeDtypeStruct((B, n_i, n_j), out_dtype),
        grid_spec=pltpu.PrefetchScalarGridSpec(
            num_scalar_prefetch=0,
            grid=(B, NI, NJ),
            in_specs=[
                pl.BlockSpec((pl.Squeezed(), TI, 1), lambda b, i, j: (b, i, 0)),
                pl.BlockSpec((pl.Squeezed(), 1, TJ), lambda b, i, j: (b, 0, j)),
            ],
            out_specs=pl.BlockSpec((pl.Squeezed(), TI, TJ),
                                   lambda b, i, j: (b, i, j)),
        ),
        compiler_params=pltpu.CompilerParams(
            # j innermost and "arbitrary": a 2-TC / megacore split lands on the
            # b / i axes (contiguous output slabs per core).
            dimension_semantics=("parallel", "parallel", "arbitrary"),
            vmem_limit_bytes=vmem_bytes),
    )(a_p, c_p)

    return out[:, :N, :N]


def edge_decoder_ref(z, weight, bias):
    # Literal port of the PyTorch forward (materializes (B, N, N, 2H)).
    B, N, H = z.shape
    z_i = jnp.broadcast_to(z[:, :, None, :], (B, N, N, H))
    z_j = jnp.broadcast_to(z[:, None, :, :], (B, N, N, H))
    feats = jnp.concatenate([z_i, z_j], axis=-1)
    return jnp.einsum("bijc,c->bij", feats, weight[0]) + bias[0]


def edge_decoder_ref_decomposed(z, weight, bias):
    # Mathematically identical, non-materializing reference (for larger N).
    H = z.shape[-1]
    a = jnp.einsum("bnh,h->bn", z, weight[0, :H])
    c = jnp.einsum("bnh,h->bn", z, weight[0, H:])
    return a[:, :, None] + c[:, None, :] + bias[0]


if __name__ == "__main__":
    # --- Small shape consistent with the module (batch=2, nodes=8, hidden=32)
    B, N, H = 2, 8, 32
    kz, kw, kb = jax.random.split(jax.random.PRNGKey(0), 3)
    z = jax.random.normal(kz, (B, N, H), dtype=jnp.float32)
    bound = 1.0 / jnp.sqrt(2.0 * H)
    weight = jax.random.uniform(kw, (1, 2 * H), minval=-bound, maxval=bound,
                                dtype=jnp.float32)
    bias = jax.random.uniform(kb, (1,), minval=-bound, maxval=bound,
                              dtype=jnp.float32)

    out = jax.block_until_ready(edge_decoder(z, weight, bias))
    ref = edge_decoder_ref(z, weight, bias)
    assert out.shape == (B, N, N)
    assert jnp.allclose(out, ref, atol=1e-5, rtol=1e-5), "mismatch (small)"

    # --- Modestly larger shape to exercise the tiled (B, N/TI, N/TJ) grid path
    B2, N2, H2 = 2, 384, 64
    kz2, kw2, kb2 = jax.random.split(jax.random.PRNGKey(1), 3)
    z2 = jax.random.normal(kz2, (B2, N2, H2), dtype=jnp.float32)
    bound2 = 1.0 / jnp.sqrt(2.0 * H2)
    w2 = jax.random.uniform(kw2, (1, 2 * H2), minval=-bound2, maxval=bound2,
                            dtype=jnp.float32)
    b2 = jax.random.uniform(kb2, (1,), minval=-bound2, maxval=bound2,
                            dtype=jnp.float32)

    out2 = jax.block_until_ready(edge_decoder(z2, w2, b2))
    ref2 = edge_decoder_ref_decomposed(z2, w2, b2)
    assert out2.shape == (B2, N2, N2)
    assert jnp.allclose(out2, ref2, atol=1e-4, rtol=1e-4), "mismatch (tiled)"

    # --- Non-multiple-of-128 N to exercise the padded/sliced lane-dense path
    B3, N3, H3 = 2, 50, 32
    z3 = jax.random.normal(jax.random.PRNGKey(2), (B3, N3, H3), dtype=jnp.float32)
    out3 = jax.block_until_ready(edge_decoder(z3, weight, bias))
    ref3 = edge_decoder_ref_decomposed(z3, weight, bias)
    assert out3.shape == (B3, N3, N3)
    assert jnp.allclose(out3, ref3, atol=1e-5, rtol=1e-5), "mismatch (padded)"

    print("KERNEL_OK")
</pallas_src>

<mosaic_0001>
module attributes {stable_mosaic.version = 11 : i64} {
  func.func @_edge_add_kernel(%arg0: i32, %arg1: i32, %arg2: i32, %arg3: memref<1x8x1xf32, #tpu.memory_space<vmem>>, %arg4: memref<1x1x128xf32, #tpu.memory_space<vmem>>, %arg5: memref<1x8x128xf32, #tpu.memory_space<vmem>>) attributes {dimension_semantics = [#tpu.dimension_semantics<parallel>, #tpu.dimension_semantics<parallel>, #tpu.dimension_semantics<arbitrary>], iteration_bounds = array<i64: 2, 1, 1>, scalar_prefetch = 0 : i64, scratch_operands = 0 : i64, tpu.core_type = #tpu.core_type<tc>, window_params = [{transform_indices = @transform_0, window_bounds = array<i64: 1, 8, 1>}, {transform_indices = @transform_1, window_bounds = array<i64: 1, 1, 128>}, {transform_indices = @transform_2, window_bounds = array<i64: 1, 8, 128>}]} {
    %c0 = arith.constant 0 : index
    %c0_0 = arith.constant 0 : index
    %c0_1 = arith.constant 0 : index
    %0 = vector.load %arg3[%c0, %c0_0, %c0_1] : memref<1x8x1xf32, #tpu.memory_space<vmem>>, vector<1x8x1xf32>
    %1 = vector.shape_cast %0 : vector<1x8x1xf32> to vector<8x1xf32>
    %c0_2 = arith.constant 0 : index
    %c0_3 = arith.constant 0 : index
    %c0_4 = arith.constant 0 : index
    %2 = vector.load %arg4[%c0_2, %c0_3, %c0_4] : memref<1x1x128xf32, #tpu.memory_space<vmem>>, vector<1x1x128xf32>
    %3 = vector.shape_cast %2 : vector<1x1x128xf32> to vector<1x128xf32>
    %4 = vector.broadcast %1 : vector<8x1xf32> to vector<8x128xf32>
    %5 = vector.broadcast %3 : vector<1x128xf32> to vector<8x128xf32>
    %6 = arith.addf %4, %5 : vector<8x128xf32>
    %c0_5 = arith.constant 0 : index
    %c0_6 = arith.constant 0 : index
    %c0_7 = arith.constant 0 : index
    %7 = vector.load %arg5[%c0_5, %c0_6, %c0_7] : memref<1x8x128xf32, #tpu.memory_space<vmem>>, vector<1x8x128xf32>
    %8 = vector.shape_cast %7 : vector<1x8x128xf32> to vector<8x128xf32>
    %9 = vector.shape_cast %6 : vector<8x128xf32> to vector<1x8x128xf32>
    tpu.vector_store %arg5[%c0_5, %c0_6, %c0_7], %9 {strides = array<i32>} : memref<1x8x128xf32, #tpu.memory_space<vmem>>, vector<1x8x128xf32>,
    return
  }
  func.func @transform_0(%arg0: i32, %arg1: i32, %arg2: i32) -> (i32, i32, i32) {
    %c0_i32 = arith.constant 0 : i32
    %c0_i32_0 = arith.constant 0 : i32
    return %arg0, %arg1, %c0_i32 : i32, i32, i32
  }
  func.func @transform_1(%arg0: i32, %arg1: i32, %arg2: i32) -> (i32, i32, i32) {
    %c0_i32 = arith.constant 0 : i32
    %c0_i32_0 = arith.constant 0 : i32
    return %arg0, %c0_i32, %arg2 : i32, i32, i32
  }
  func.func @transform_2(%arg0: i32, %arg1: i32, %arg2: i32) -> (i32, i32, i32) {
    %c0_i32 = arith.constant 0 : i32
    return %arg0, %arg1, %arg2 : i32, i32, i32
  }
}

</mosaic_0001>

<bundles_post_ra>
// kernel: tpu_custom_call.1
= control target key start
LH: loop header
LB: loop body
LE: loop exit
PB: predicated region body
PF: predicated region fallthrough
CT: control target
= control target key end

     0   :  { %7 = vsyncpa [#allocation3], 0  ;;  %s597_s0 = inlined_call_operand.vmem [shape: f32[2,8,1], index: 0, kind: input, shape index: {}]   ;;  %s598_s1 = inlined_call_operand.vmem [shape: f32[2,1,128], index: 1, kind: input, shape index: {}]   ;;  %s599_s2 = inlined_call_operand.hbm [shape: f32[2,8,128], index: 2, kind: output, shape index: {}]  }
   0x1   :  { %9 = vsyncpa [#allocation3 + $0x1], 0  ;;  %s482_s9 = smov 0   ;;  %s484_s10 = smov 0  }
   0x2   :  { %s486_s11 = smov 0   ;;  %s488_s12 = smov 0  }
   0x3   :  { %s490_s13 = smov 0   ;;  %s492_s14 = smov 0  }
   0x4 LB: > { %s316_s15 = sadd.s32 4294967295, %s463_s14   ;;  %s317_s16 = sadd.s32 4294967294, %s463_s14   ;;  %s463_s14 = sphi %s492_s14, %s15_s14   ;;  %s459_s13 = sphi %s490_s13, %s606_s13   ;;  %s455_s12 = sphi %s488_s12, %s605_s12   ;;  %s451_s11 = sphi %s486_s11, %s604_s11   ;;  %s447_s10 = sphi %s484_s10, %s603_s10   ;;  %s443_s9 = sphi %s482_s9, %s602_s9  }
   0x5   : > { %s34_s17 = sadd.s32 1, %s459_s13  ;;  %s101_s18 = sadd.s32 1, %s451_s11 }
   0x6   : > { %p36_p0 = scmp.ge.s32.totalorder %s34_s17, 2  ;;  %p111_p1 = scmp.ne.s32.totalorder %s451_s11, %s447_s10 }
   0x7   : > { %p112_p2 = scmp.eq.s32.totalorder %s316_s15, 1  ;;  %p117_p3 = scmp.ne.s32.totalorder %s447_s10, %s443_s9 }
   0x8   : > { %s608_s17 = smov (%p36_p0, %s34_s17), 0  ;;  %p118_p5 = scmp.eq.s32.totalorder %s317_s16, 1 }
   0x9   : > { %p522_p4 = por %p112_p2, %p111_p1  ;;  %s94_s20 = ssub.s32 %s459_s13, %s608_s17 }
   0xa   : > { %p320_p6 = scmp.ge.s32.totalorder %s463_s14, 1  ;;  %p99_p7 = scmp.eq.s32.totalorder %s94_s20, 0 }
   0xb   : > { %p529_p8 = por %p118_p5, %p117_p3  ;;  %p155_p9 = scmp.lt.s32.totalorder %s463_s14, 3 }
   0xc   : > { %s535_s22 = scalar_select %p99_p7, %s451_s11, %s101_s18  }
   0xd   : > { %p156_p10 = pnand %p320_p6, %p155_p9 }
   0xe   : > { %p185_p11 = scmp.lt.s32.totalorder (!%p156_p10), %s455_s12, 1  ;;  %v465_v0 = vmov (!%p156_p10), 0   ;;  %s182_s28 = sand.u32 (!%p156_p10), 1, %s447_s10  }
   0xf   : > { %159 = sbr.rel (%p156_p10) target bundleno = 171 (0xab), region = 28  ;;  %384 = vset.pattern.permute.xlu0 (!%p156_p10), %v465_v0  ;;  %s321_s29 = sshll.u32 (!%p156_p10), %s182_s28, 3 }
  0x10   : > { %s325_s5 = sshll.u32 (!%p156_p10), %s455_s12, 7  ;;  %s184_s6 = scalar_lea.vmem (!%p156_p10), [#allocation2], %s321_s29 }
  0x11   : > { %s229_s7 = sshll.u32 (!%p156_p10), %s184_s6, 4  ;;  %s550_s16 = scalar_lea.hbm (!%p156_p10), %s599_s2, %s325_s5  ;;  %s552_s7 = int_to_ptr.vmem [resolvable:$true] %s229_s7 }
  0x12   : > { %s214_s18 = scalar_lea.sflag (!%p156_p10), [#allocation3], %s182_s28  ;;  %s385_s20 = scalar_lea.vmem (!%p156_p10), %s552_s7, 128 }
  0x13   : > { %p386_p12 = scmp.ne.s32.totalorder (!%p156_p10), %s552_s7, %s385_s20 }
  0x15   : > { %p387_p13 = pnand (!%p156_p10), %p386_p12, %p522_p4 }
  0x16   : > { %s186_s23 = scalar_select %p185_p11, %s455_s12, 1 }
  0x17   : > { %p388_p0 = pneg %p387_p13  ;;  %s466_s12 = smov [#allocation2]  }
  0x18   : > { %s322_s24 = sshll.u32 %s186_s23, 3  ;;  %s197_s4 = scalar_lea.vmem %s598_s1, %s186_s23 }
  0x19   : > { %s191_s27 = scalar_lea.vmem %s597_s0, %s322_s24  ;;  %v323_v2 = vld [vmem:[%s197_s4] ss:$0 sm:$0xff]  ;;  %s389_s23 = sshll.u32 %s466_s12, 4  ;;  %s390_s23 = int_to_ptr.vmem [resolvable:$false] %s389_s23 }
  0x1a   : > { %v198_v1 = vld [vmem:[%s191_s27] sm:$0xff]  ;;  %s391_s24 = scalar_lea.vmem %s390_s23, 256  ;;  %p392_p1 = scmp.lt.s32.totalorder %s552_s7, %s390_s23 }
  0x1b   : > { %202 = vperm.xlu0 %384, %v198_v1   ;;  %p393_p2 = scmp.lt.s32.totalorder %s391_s24, %s385_s20 }
  0x1d   : > { %p394_p3 = por %p393_p2, %p392_p1 }
  0x1f   : > { %p395_p5 = pnand %p394_p3, %p388_p0 }
  0x9a   : > { %v203_v3 = vpop.permute.xlu0 %202 }
  0x9b   : > { %v211_v4 = vadd.f32 %v323_v2, %v203_v3 }
  0x9d   : > { %212 = vst [vmem:[%s184_s6] sm:$0xff] %v211_v4 }
  0x9e   : > { %398 = shalt.err (!%p395_p5)
}
  0x9f   : > { %s399_s25 = scalar_lea.hbm %s550_s16, 128  ;;  %s403_s28 = scalar_lea.hbm %s599_s2, 256 }
  0xa0   : > { %p400_p6 = scmp.ne.s32.totalorder %s550_s16, %s399_s25  ;;  %p404_p10 = scmp.lt.u32.totalorder %s550_s16, %s599_s2 }
  0xa1   : > { %p405_p11 = scmp.lt.u32.totalorder %s403_s28, %s399_s25  ;;  %p407_p13 = scmp.lt.u32.totalorder %s399_s25, %s550_s16 }
  0xa2   : > { %p401_p7 = pnand %p400_p6, %p522_p4 }
  0xa3   : > { %p406_p12 = por %p405_p11, %p404_p10 }
  0xa4   : > { %p402_p9 = pneg %p401_p7 }
  0xa5   : > { %p408_p0 = por %p407_p13, %p406_p12 }
  0xa7   : > { %p409_p1 = pnand %p408_p0, %p402_p9 }
  0xa9   : > { %412 = shalt.err (!%p409_p1)
}
  0xaa   : > { %328 = dma.vmem_to_hbm [thread:$0]  (%p522_p4), %s552_s7, 128, %s550_s16, %s214_s18  }
  0xab PF: > { %p334_p2 = scmp.ge.s32.totalorder %s463_s14, 2  ;;  %s241_s3 = sand.u32 1, %s443_s9  }
  0xac   : > { %s242_s4 = scalar_lea.sflag [#allocation3], %s241_s3 }
  0xad   : > { %p331_p3 = pnand %p334_p2, %p529_p8 }
  0xaf   : > { %438 = dma.done.wait (!%p331_p3), %s242_s4, 128  }
  0xb0   : > { %440 = vsyncadd (!%p331_p3), %s242_s4, 4294967168  ;;  %s15_s14 = sadd.s32 1, %s463_s14   ;;  %s602_s9 = smov %s447_s10 }
  0xb1   : > { %p12_p5 = scmp.ge.s32.totalorder %s15_s14, 4   ;;  %s603_s10 = smov %s451_s11 }
  0xb2   : > { %s604_s11 = smov %s535_s22  ;;  %s605_s12 = smov %s459_s13 }
  0xb3   : > { %s606_s13 = smov %s608_s17  ;;  %14 = sbr.rel (!%p12_p5) target bundleno = 4 (0x4), region = 66 }
  0xba   :  { %247 = vsyncpa [#allocation3], 1 }
  0xbb   :  { %249 = vsyncpa [#allocation3 + $0x1], 1 }

</bundles_post_ra>
